<compile_context>
chip_gen: v7x
topology: tpu7x:2x2x1
jax: 0.10.0
libtpu: 0.0.40
codegen_flags: <defaults>
</compile_context>

<pallas_src>
import jax
import jax.numpy as jnp
from jax import lax
from jax.experimental import pallas as pl
from jax.experimental.pallas import tpu as pltpu

_LANE = 128


def _dwcorr_kernel(x_ref, k_ref, o_ref):
    # x_ref: (H,  W,  G) search features, groups on the lane axis
    # k_ref: (kh, kw, G) template features, groups on the lane axis
    # o_ref: (Ho, Wo, G) VALID cross-correlation output
    Ho, Wo, G = o_ref.shape
    kh, kw, _ = k_ref.shape

    def row_body(ho, carry):
        # Per-output-row accumulator: ceil(Wo/8)*(G/128) vregs, stays
        # register-resident -> kernel is cleanly VALU-bound.
        acc = jnp.zeros((Wo, G), jnp.float32)
        for di in range(kh):                                     # static taps
            # One lane-dense row-slab load per di (dynamic leading index is a
            # plain address offset, no tiling constraint).  astype is a no-op
            # for f32 inputs.
            # TODO(synk): for bf16 inputs on v5e, convert the whole x block
            # into an f32 VMEM scratch once per grid step instead.
            row = x_ref[ho + di, :, :].astype(jnp.float32)       # (W, G)
            for dj in range(kw):
                # dj-shifted view of the already-loaded row slab (value
                # slice -> sublane shift on the otherwise-idle XLU slot).
                xs = row[dj:dj + Wo, :]                          # (Wo, G)
                # Lane-dense per-tap weight; broadcast across sublanes is
                # folded into the multiply (tiny vs. the VALU work).
                ws = k_ref[di, pl.ds(dj, 1), :].astype(jnp.float32)  # (1, G)
                acc = acc + xs * ws          # full-width VPU FMA, f32 accum
        o_ref[pl.ds(ho, 1), :, :] = acc[None].astype(o_ref.dtype)
        return carry

    lax.fori_loop(0, Ho, row_body, 0)


def _pick_group_block(bc_pad, max_block):
    """Largest multiple of 128 that divides bc_pad, <= max_block, preferring
    >= 2 grid steps so both v7x TensorCores get work."""
    n = bc_pad // _LANE
    cands = [m * _LANE for m in range(1, n + 1) if bc_pad % (m * _LANE) == 0]
    cands = [g for g in cands if g <= max_block] or [_LANE]
    two_step = [g for g in cands if bc_pad // g >= 2]
    return max(two_step if two_step else cands)


def depthwise_conv2_group(x, kernel, *, group_block=512):
    """x: (B, C, H, W); kernel: (B, C, kh, kw) -> (B, C, H-kh+1, W-kw+1).

    Matches F.conv2d(input.view(1, B*C, H, W), kernel.view(B*C, 1, kh, kw),
    groups=B*C): true cross-correlation (no kernel flip), VALID padding.
    """
    B, C, H, W = x.shape
    Bk, Ck, kh, kw = kernel.shape
    assert (B, C) == (Bk, Ck), "input/kernel batch & channel must match"
    BC = B * C
    Ho, Wo = H - kh + 1, W - kw + 1

    # ---- group axis -> lane axis ------------------------------------------
    # TODO(synk): these transposes (and the inverse below) are separate XLA
    # HBM passes; propagate the groups-last layout to the producer/consumer
    # if this op's end-to-end wall clock matters.
    x_t = jnp.transpose(x.reshape(BC, H, W), (1, 2, 0))          # (H, W, BC)
    k_t = jnp.transpose(kernel.reshape(BC, kh, kw), (1, 2, 0))   # (kh, kw, BC)

    # Pad groups only to the 128-lane width (minimizes zero-lane waste), then
    # pick a group block G that divides the padded count.
    BC_pad = pl.cdiv(BC, _LANE) * _LANE
    if BC_pad != BC:
        pad = BC_pad - BC
        x_t = jnp.pad(x_t, ((0, 0), (0, 0), (0, pad)))
        k_t = jnp.pad(k_t, ((0, 0), (0, 0), (0, pad)))

    G = _pick_group_block(BC_pad, group_block)
    # VMEM footprint per grid step (double-buffered x + out blocks) stays in
    # the low-MB range even at production sizes (31x31 search, G=512 f32),
    # well under the v7x 32 MiB scoped default.

    out = pl.pallas_call(
        _dwcorr_kernel,
        out_shape=jax.ShapeDtypeStruct((Ho, Wo, BC_pad), x.dtype),
        grid=(BC_pad // G,),
        in_specs=[
            pl.BlockSpec((H, W, G), lambda g: (0, 0, g)),
            pl.BlockSpec((kh, kw, G), lambda g: (0, 0, g)),
        ],
        out_specs=pl.BlockSpec((Ho, Wo, G), lambda g: (0, 0, g)),
        compiler_params=pltpu.CompilerParams(
            dimension_semantics=("parallel",),
        ),
    )(x_t, k_t)

    out = jnp.transpose(out[:, :, :BC], (2, 0, 1))               # (BC, Ho, Wo)
    return out.reshape(B, C, Ho, Wo)


def _reference(x, kernel):
    """Pure-JAX reference mirroring F.conv2d(groups=B*C)."""
    B, C, H, W = x.shape
    _, _, kh, kw = kernel.shape
    BC = B * C
    lhs = x.reshape(1, BC, H, W)
    rhs = kernel.reshape(BC, 1, kh, kw)
    out = jax.lax.conv_general_dilated(
        lhs, rhs,
        window_strides=(1, 1),
        padding="VALID",
        dimension_numbers=("NCHW", "OIHW", "NCHW"),
        feature_group_count=BC,
    )
    return out.reshape(B, C, H - kh + 1, W - kw + 1)


if __name__ == "__main__":
    # Module has no learned parameters: both `input` and `kernel` are forward
    # inputs (search features and template features in SiamMask).
    key = jax.random.PRNGKey(0)

    configs = [
        # (B, C, H, W, kh, kw) — small shapes; second config exercises the
        # group-padding path and a multi-step grid (BC=192 -> pad 256, G=128).
        (2, 4, 16, 16, 5, 5),
        (2, 96, 12, 12, 3, 3),
    ]

    for idx, (B, C, H, W, kh, kw) in enumerate(configs):
        kx, kk, key = jax.random.split(key, 3)
        x = jax.random.normal(kx, (B, C, H, W), dtype=jnp.float32)
        kern = jax.random.normal(kk, (B, C, kh, kw), dtype=jnp.float32)

        out = jax.block_until_ready(depthwise_conv2_group(x, kern))
        ref = jax.block_until_ready(_reference(x, kern))

        assert out.shape == (B, C, H - kh + 1, W - kw + 1)
        assert jnp.allclose(out, ref, atol=1e-4, rtol=1e-4), f"mismatch in config {idx}"

    print("KERNEL_OK")
</pallas_src>

<mosaic_0001>
module attributes {stable_mosaic.version = 11 : i64} {
  func.func @_dwcorr_kernel(%arg0: i32, %arg1: memref<16x16x128xf32, #tpu.memory_space<vmem>>, %arg2: memref<5x5x128xf32, #tpu.memory_space<vmem>>, %arg3: memref<12x12x128xf32, #tpu.memory_space<vmem>>) attributes {dimension_semantics = [#tpu.dimension_semantics<parallel>], iteration_bounds = array<i64: 1>, scalar_prefetch = 0 : i64, scratch_operands = 0 : i64, tpu.core_type = #tpu.core_type<tc>, window_params = [{transform_indices = @transform_0, window_bounds = array<i64: 16, 16, 128>}, {transform_indices = @transform_1, window_bounds = array<i64: 5, 5, 128>}, {transform_indices = @transform_2, window_bounds = array<i64: 12, 12, 128>}]} {
    %c0_i32 = arith.constant 0 : i32
    %c12_i32 = arith.constant 12 : i32
    %0 = arith.addi %c0_i32, %c12_i32 : i32
    %c1_i32 = arith.constant 1 : i32
    scf.for %arg4 = %c0_i32 to %0 step %c1_i32  : i32 {
      %cst = arith.constant 0.000000e+00 : f32
      %1 = vector.broadcast %cst : f32 to vector<12x128xf32>
      %c0_i32_1 = arith.constant 0 : i32
      %2 = arith.addi %arg4, %c0_i32_1 : i32
      %3 = arith.index_cast %2 : i32 to index
      %c0 = arith.constant 0 : index
      %c0_2 = arith.constant 0 : index
      %4 = vector.load %arg1[%3, %c0, %c0_2] : memref<16x16x128xf32, #tpu.memory_space<vmem>>, vector<1x16x128xf32>
      %5 = vector.shape_cast %4 : vector<1x16x128xf32> to vector<16x128xf32>
      %6 = vector.extract_strided_slice %5 {offsets = [0, 0], sizes = [12, 128], strides = [1, 1]} : vector<16x128xf32> to vector<12x128xf32>
      %c0_3 = arith.constant 0 : index
      %c0_4 = arith.constant 0 : index
      %c0_5 = arith.constant 0 : index
      %7 = vector.load %arg2[%c0_3, %c0_4, %c0_5] : memref<5x5x128xf32, #tpu.memory_space<vmem>>, vector<1x1x128xf32>
      %8 = vector.shape_cast %7 : vector<1x1x128xf32> to vector<1x128xf32>
      %9 = vector.broadcast %8 : vector<1x128xf32> to vector<12x128xf32>
      %10 = arith.mulf %6, %9 : vector<12x128xf32>
      %11 = arith.addf %1, %10 : vector<12x128xf32>
      %12 = vector.extract_strided_slice %5 {offsets = [1, 0], sizes = [12, 128], strides = [1, 1]} : vector<16x128xf32> to vector<12x128xf32>
      %c0_6 = arith.constant 0 : index
      %c1 = arith.constant 1 : index
      %c0_7 = arith.constant 0 : index
      %13 = vector.load %arg2[%c0_6, %c1, %c0_7] : memref<5x5x128xf32, #tpu.memory_space<vmem>>, vector<1x1x128xf32>
      %14 = vector.shape_cast %13 : vector<1x1x128xf32> to vector<1x128xf32>
      %15 = vector.broadcast %14 : vector<1x128xf32> to vector<12x128xf32>
      %16 = arith.mulf %12, %15 : vector<12x128xf32>
      %17 = arith.addf %11, %16 : vector<12x128xf32>
      %18 = vector.extract_strided_slice %5 {offsets = [2, 0], sizes = [12, 128], strides = [1, 1]} : vector<16x128xf32> to vector<12x128xf32>
      %c0_8 = arith.constant 0 : index
      %c2 = arith.constant 2 : index
      %c0_9 = arith.constant 0 : index
      %19 = vector.load %arg2[%c0_8, %c2, %c0_9] : memref<5x5x128xf32, #tpu.memory_space<vmem>>, vector<1x1x128xf32>
      %20 = vector.shape_cast %19 : vector<1x1x128xf32> to vector<1x128xf32>
      %21 = vector.broadcast %20 : vector<1x128xf32> to vector<12x128xf32>
      %22 = arith.mulf %18, %21 : vector<12x128xf32>
      %23 = arith.addf %17, %22 : vector<12x128xf32>
      %24 = vector.extract_strided_slice %5 {offsets = [3, 0], sizes = [12, 128], strides = [1, 1]} : vector<16x128xf32> to vector<12x128xf32>
      %c0_10 = arith.constant 0 : index
      %c3 = arith.constant 3 : index
      %c0_11 = arith.constant 0 : index
      %25 = vector.load %arg2[%c0_10, %c3, %c0_11] : memref<5x5x128xf32, #tpu.memory_space<vmem>>, vector<1x1x128xf32>
      %26 = vector.shape_cast %25 : vector<1x1x128xf32> to vector<1x128xf32>
      %27 = vector.broadcast %26 : vector<1x128xf32> to vector<12x128xf32>
      %28 = arith.mulf %24, %27 : vector<12x128xf32>
      %29 = arith.addf %23, %28 : vector<12x128xf32>
      %30 = vector.extract_strided_slice %5 {offsets = [4, 0], sizes = [12, 128], strides = [1, 1]} : vector<16x128xf32> to vector<12x128xf32>
      %c0_12 = arith.constant 0 : index
      %c4 = arith.constant 4 : index
      %c0_13 = arith.constant 0 : index
      %31 = vector.load %arg2[%c0_12, %c4, %c0_13] : memref<5x5x128xf32, #tpu.memory_space<vmem>>, vector<1x1x128xf32>
      %32 = vector.shape_cast %31 : vector<1x1x128xf32> to vector<1x128xf32>
      %33 = vector.broadcast %32 : vector<1x128xf32> to vector<12x128xf32>
      %34 = arith.mulf %30, %33 : vector<12x128xf32>
      %35 = arith.addf %29, %34 : vector<12x128xf32>
      %c1_i32_14 = arith.constant 1 : i32
      %36 = arith.addi %arg4, %c1_i32_14 : i32
      %37 = arith.index_cast %36 : i32 to index
      %c0_15 = arith.constant 0 : index
      %c0_16 = arith.constant 0 : index
      %38 = vector.load %arg1[%37, %c0_15, %c0_16] : memref<16x16x128xf32, #tpu.memory_space<vmem>>, vector<1x16x128xf32>
      %39 = vector.shape_cast %38 : vector<1x16x128xf32> to vector<16x128xf32>
      %40 = vector.extract_strided_slice %39 {offsets = [0, 0], sizes = [12, 128], strides = [1, 1]} : vector<16x128xf32> to vector<12x128xf32>
      %c1_17 = arith.constant 1 : index
      %c0_18 = arith.constant 0 : index
      %c0_19 = arith.constant 0 : index
      %41 = vector.load %arg2[%c1_17, %c0_18, %c0_19] : memref<5x5x128xf32, #tpu.memory_space<vmem>>, vector<1x1x128xf32>
      %42 = vector.shape_cast %41 : vector<1x1x128xf32> to vector<1x128xf32>
      %43 = vector.broadcast %42 : vector<1x128xf32> to vector<12x128xf32>
      %44 = arith.mulf %40, %43 : vector<12x128xf32>
      %45 = arith.addf %35, %44 : vector<12x128xf32>
      %46 = vector.extract_strided_slice %39 {offsets = [1, 0], sizes = [12, 128], strides = [1, 1]} : vector<16x128xf32> to vector<12x128xf32>
      %c1_20 = arith.constant 1 : index
      %c1_21 = arith.constant 1 : index
      %c0_22 = arith.constant 0 : index
      %47 = vector.load %arg2[%c1_20, %c1_21, %c0_22] : memref<5x5x128xf32, #tpu.memory_space<vmem>>, vector<1x1x128xf32>
      %48 = vector.shape_cast %47 : vector<1x1x128xf32> to vector<1x128xf32>
      %49 = vector.broadcast %48 : vector<1x128xf32> to vector<12x128xf32>
      %50 = arith.mulf %46, %49 : vector<12x128xf32>
      %51 = arith.addf %45, %50 : vector<12x128xf32>
      %52 = vector.extract_strided_slice %39 {offsets = [2, 0], sizes = [12, 128], strides = [1, 1]} : vector<16x128xf32> to vector<12x128xf32>
      %c1_23 = arith.constant 1 : index
      %c2_24 = arith.constant 2 : index
      %c0_25 = arith.constant 0 : index
      %53 = vector.load %arg2[%c1_23, %c2_24, %c0_25] : memref<5x5x128xf32, #tpu.memory_space<vmem>>, vector<1x1x128xf32>
      %54 = vector.shape_cast %53 : vector<1x1x128xf32> to vector<1x128xf32>
      %55 = vector.broadcast %54 : vector<1x128xf32> to vector<12x128xf32>
      %56 = arith.mulf %52, %55 : vector<12x128xf32>
      %57 = arith.addf %51, %56 : vector<12x128xf32>
      %58 = vector.extract_strided_slice %39 {offsets = [3, 0], sizes = [12, 128], strides = [1, 1]} : vector<16x128xf32> to vector<12x128xf32>
      %c1_26 = arith.constant 1 : index
      %c3_27 = arith.constant 3 : index
      %c0_28 = arith.constant 0 : index
      %59 = vector.load %arg2[%c1_26, %c3_27, %c0_28] : memref<5x5x128xf32, #tpu.memory_space<vmem>>, vector<1x1x128xf32>
      %60 = vector.shape_cast %59 : vector<1x1x128xf32> to vector<1x128xf32>
      %61 = vector.broadcast %60 : vector<1x128xf32> to vector<12x128xf32>
      %62 = arith.mulf %58, %61 : vector<12x128xf32>
      %63 = arith.addf %57, %62 : vector<12x128xf32>
      %64 = vector.extract_strided_slice %39 {offsets = [4, 0], sizes = [12, 128], strides = [1, 1]} : vector<16x128xf32> to vector<12x128xf32>
      %c1_29 = arith.constant 1 : index
      %c4_30 = arith.constant 4 : index
      %c0_31 = arith.constant 0 : index
      %65 = vector.load %arg2[%c1_29, %c4_30, %c0_31] : memref<5x5x128xf32, #tpu.memory_space<vmem>>, vector<1x1x128xf32>
      %66 = vector.shape_cast %65 : vector<1x1x128xf32> to vector<1x128xf32>
      %67 = vector.broadcast %66 : vector<1x128xf32> to vector<12x128xf32>
      %68 = arith.mulf %64, %67 : vector<12x128xf32>
      %69 = arith.addf %63, %68 : vector<12x128xf32>
      %c2_i32 = arith.constant 2 : i32
      %70 = arith.addi %arg4, %c2_i32 : i32
      %71 = arith.index_cast %70 : i32 to index
      %c0_32 = arith.constant 0 : index
      %c0_33 = arith.constant 0 : index
      %72 = vector.load %arg1[%71, %c0_32, %c0_33] : memref<16x16x128xf32, #tpu.memory_space<vmem>>, vector<1x16x128xf32>
      %73 = vector.shape_cast %72 : vector<1x16x128xf32> to vector<16x128xf32>
      %74 = vector.extract_strided_slice %73 {offsets = [0, 0], sizes = [12, 128], strides = [1, 1]} : vector<16x128xf32> to vector<12x128xf32>
      %c2_34 = arith.constant 2 : index
      %c0_35 = arith.constant 0 : index
      %c0_36 = arith.constant 0 : index
      %75 = vector.load %arg2[%c2_34, %c0_35, %c0_36] : memref<5x5x128xf32, #tpu.memory_space<vmem>>, vector<1x1x128xf32>
      %76 = vector.shape_cast %75 : vector<1x1x128xf32> to vector<1x128xf32>
      %77 = vector.broadcast %76 : vector<1x128xf32> to vector<12x128xf32>
      %78 = arith.mulf %74, %77 : vector<12x128xf32>
      %79 = arith.addf %69, %78 : vector<12x128xf32>
      %80 = vector.extract_strided_slice %73 {offsets = [1, 0], sizes = [12, 128], strides = [1, 1]} : vector<16x128xf32> to vector<12x128xf32>
      %c2_37 = arith.constant 2 : index
      %c1_38 = arith.constant 1 : index
      %c0_39 = arith.constant 0 : index
      %81 = vector.load %arg2[%c2_37, %c1_38, %c0_39] : memref<5x5x128xf32, #tpu.memory_space<vmem>>, vector<1x1x128xf32>
      %82 = vector.shape_cast %81 : vector<1x1x128xf32> to vector<1x128xf32>
      %83 = vector.broadcast %82 : vector<1x128xf32> to vector<12x128xf32>
      %84 = arith.mulf %80, %83 : vector<12x128xf32>
      %85 = arith.addf %79, %84 : vector<12x128xf32>
      %86 = vector.extract_strided_slice %73 {offsets = [2, 0], sizes = [12, 128], strides = [1, 1]} : vector<16x128xf32> to vector<12x128xf32>
      %c2_40 = arith.constant 2 : index
      %c2_41 = arith.constant 2 : index
      %c0_42 = arith.constant 0 : index
      %87 = vector.load %arg2[%c2_40, %c2_41, %c0_42] : memref<5x5x128xf32, #tpu.memory_space<vmem>>, vector<1x1x128xf32>
      %88 = vector.shape_cast %87 : vector<1x1x128xf32> to vector<1x128xf32>
      %89 = vector.broadcast %88 : vector<1x128xf32> to vector<12x128xf32>
      %90 = arith.mulf %86, %89 : vector<12x128xf32>
      %91 = arith.addf %85, %90 : vector<12x128xf32>
      %92 = vector.extract_strided_slice %73 {offsets = [3, 0], sizes = [12, 128], strides = [1, 1]} : vector<16x128xf32> to vector<12x128xf32>
      %c2_43 = arith.constant 2 : index
      %c3_44 = arith.constant 3 : index
      %c0_45 = arith.constant 0 : index
      %93 = vector.load %arg2[%c2_43, %c3_44, %c0_45] : memref<5x5x128xf32, #tpu.memory_space<vmem>>, vector<1x1x128xf32>
      %94 = vector.shape_cast %93 : vector<1x1x128xf32> to vector<1x128xf32>
      %95 = vector.broadcast %94 : vector<1x128xf32> to vector<12x128xf32>
      %96 = arith.mulf %92, %95 : vector<12x128xf32>
      %97 = arith.addf %91, %96 : vector<12x128xf32>
      %98 = vector.extract_strided_slice %73 {offsets = [4, 0], sizes = [12, 128], strides = [1, 1]} : vector<16x128xf32> to vector<12x128xf32>
      %c2_46 = arith.constant 2 : index
      %c4_47 = arith.constant 4 : index
      %c0_48 = arith.constant 0 : index
      %99 = vector.load %arg2[%c2_46, %c4_47, %c0_48] : memref<5x5x128xf32, #tpu.memory_space<vmem>>, vector<1x1x128xf32>
      %100 = vector.shape_cast %99 : vector<1x1x128xf32> to vector<1x128xf32>
      %101 = vector.broadcast %100 : vector<1x128xf32> to vector<12x128xf32>
      %102 = arith.mulf %98, %101 : vector<12x128xf32>
      %103 = arith.addf %97, %102 : vector<12x128xf32>
      %c3_i32 = arith.constant 3 : i32
      %104 = arith.addi %arg4, %c3_i32 : i32
      %105 = arith.index_cast %104 : i32 to index
      %c0_49 = arith.constant 0 : index
      %c0_50 = arith.constant 0 : index
      %106 = vector.load %arg1[%105, %c0_49, %c0_50] : memref<16x16x128xf32, #tpu.memory_space<vmem>>, vector<1x16x128xf32>
      %107 = vector.shape_cast %106 : vector<1x16x128xf32> to vector<16x128xf32>
      %108 = vector.extract_strided_slice %107 {offsets = [0, 0], sizes = [12, 128], strides = [1, 1]} : vector<16x128xf32> to vector<12x128xf32>
      %c3_51 = arith.constant 3 : index
      %c0_52 = arith.constant 0 : index
      %c0_53 = arith.constant 0 : index
      %109 = vector.load %arg2[%c3_51, %c0_52, %c0_53] : memref<5x5x128xf32, #tpu.memory_space<vmem>>, vector<1x1x128xf32>
      %110 = vector.shape_cast %109 : vector<1x1x128xf32> to vector<1x128xf32>
      %111 = vector.broadcast %110 : vector<1x128xf32> to vector<12x128xf32>
      %112 = arith.mulf %108, %111 : vector<12x128xf32>
      %113 = arith.addf %103, %112 : vector<12x128xf32>
      %114 = vector.extract_strided_slice %107 {offsets = [1, 0], sizes = [12, 128], strides = [1, 1]} : vector<16x128xf32> to vector<12x128xf32>
      %c3_54 = arith.constant 3 : index
      %c1_55 = arith.constant 1 : index
      %c0_56 = arith.constant 0 : index
      %115 = vector.load %arg2[%c3_54, %c1_55, %c0_56] : memref<5x5x128xf32, #tpu.memory_space<vmem>>, vector<1x1x128xf32>
      %116 = vector.shape_cast %115 : vector<1x1x128xf32> to vector<1x128xf32>
      %117 = vector.broadcast %116 : vector<1x128xf32> to vector<12x128xf32>
      %118 = arith.mulf %114, %117 : vector<12x128xf32>
      %119 = arith.addf %113, %118 : vector<12x128xf32>
      %120 = vector.extract_strided_slice %107 {offsets = [2, 0], sizes = [12, 128], strides = [1, 1]} : vector<16x128xf32> to vector<12x128xf32>
      %c3_57 = arith.constant 3 : index
      %c2_58 = arith.constant 2 : index
      %c0_59 = arith.constant 0 : index
      %121 = vector.load %arg2[%c3_57, %c2_58, %c0_59] : memref<5x5x128xf32, #tpu.memory_space<vmem>>, vector<1x1x128xf32>
      %122 = vector.shape_cast %121 : vector<1x1x128xf32> to vector<1x128xf32>
      %123 = vector.broadcast %122 : vector<1x128xf32> to vector<12x128xf32>
      %124 = arith.mulf %120, %123 : vector<12x128xf32>
      %125 = arith.addf %119, %124 : vector<12x128xf32>
      %126 = vector.extract_strided_slice %107 {offsets = [3, 0], sizes = [12, 128], strides = [1, 1]} : vector<16x128xf32> to vector<12x128xf32>
      %c3_60 = arith.constant 3 : index
      %c3_61 = arith.constant 3 : index
      %c0_62 = arith.constant 0 : index
      %127 = vector.load %arg2[%c3_60, %c3_61, %c0_62] : memref<5x5x128xf32, #tpu.memory_space<vmem>>, vector<1x1x128xf32>
      %128 = vector.shape_cast %127 : vector<1x1x128xf32> to vector<1x128xf32>
      %129 = vector.broadcast %128 : vector<1x128xf32> to vector<12x128xf32>
      %130 = arith.mulf %126, %129 : vector<12x128xf32>
      %131 = arith.addf %125, %130 : vector<12x128xf32>
      %132 = vector.extract_strided_slice %107 {offsets = [4, 0], sizes = [12, 128], strides = [1, 1]} : vector<16x128xf32> to vector<12x128xf32>
      %c3_63 = arith.constant 3 : index
      %c4_64 = arith.constant 4 : index
      %c0_65 = arith.constant 0 : index
      %133 = vector.load %arg2[%c3_63, %c4_64, %c0_65] : memref<5x5x128xf32, #tpu.memory_space<vmem>>, vector<1x1x128xf32>
      %134 = vector.shape_cast %133 : vector<1x1x128xf32> to vector<1x128xf32>
      %135 = vector.broadcast %134 : vector<1x128xf32> to vector<12x128xf32>
      %136 = arith.mulf %132, %135 : vector<12x128xf32>
      %137 = arith.addf %131, %136 : vector<12x128xf32>
      %c4_i32 = arith.constant 4 : i32
      %138 = arith.addi %arg4, %c4_i32 : i32
      %139 = arith.index_cast %138 : i32 to index
      %c0_66 = arith.constant 0 : index
      %c0_67 = arith.constant 0 : index
      %140 = vector.load %arg1[%139, %c0_66, %c0_67] : memref<16x16x128xf32, #tpu.memory_space<vmem>>, vector<1x16x128xf32>
      %141 = vector.shape_cast %140 : vector<1x16x128xf32> to vector<16x128xf32>
      %142 = vector.extract_strided_slice %141 {offsets = [0, 0], sizes = [12, 128], strides = [1, 1]} : vector<16x128xf32> to vector<12x128xf32>
      %c4_68 = arith.constant 4 : index
      %c0_69 = arith.constant 0 : index
      %c0_70 = arith.constant 0 : index
      %143 = vector.load %arg2[%c4_68, %c0_69, %c0_70] : memref<5x5x128xf32, #tpu.memory_space<vmem>>, vector<1x1x128xf32>
      %144 = vector.shape_cast %143 : vector<1x1x128xf32> to vector<1x128xf32>
      %145 = vector.broadcast %144 : vector<1x128xf32> to vector<12x128xf32>
      %146 = arith.mulf %142, %145 : vector<12x128xf32>
      %147 = arith.addf %137, %146 : vector<12x128xf32>
      %148 = vector.extract_strided_slice %141 {offsets = [1, 0], sizes = [12, 128], strides = [1, 1]} : vector<16x128xf32> to vector<12x128xf32>
      %c4_71 = arith.constant 4 : index
      %c1_72 = arith.constant 1 : index
      %c0_73 = arith.constant 0 : index
      %149 = vector.load %arg2[%c4_71, %c1_72, %c0_73] : memref<5x5x128xf32, #tpu.memory_space<vmem>>, vector<1x1x128xf32>
      %150 = vector.shape_cast %149 : vector<1x1x128xf32> to vector<1x128xf32>
      %151 = vector.broadcast %150 : vector<1x128xf32> to vector<12x128xf32>
      %152 = arith.mulf %148, %151 : vector<12x128xf32>
      %153 = arith.addf %147, %152 : vector<12x128xf32>
      %154 = vector.extract_strided_slice %141 {offsets = [2, 0], sizes = [12, 128], strides = [1, 1]} : vector<16x128xf32> to vector<12x128xf32>
      %c4_74 = arith.constant 4 : index
      %c2_75 = arith.constant 2 : index
      %c0_76 = arith.constant 0 : index
      %155 = vector.load %arg2[%c4_74, %c2_75, %c0_76] : memref<5x5x128xf32, #tpu.memory_space<vmem>>, vector<1x1x128xf32>
      %156 = vector.shape_cast %155 : vector<1x1x128xf32> to vector<1x128xf32>
      %157 = vector.broadcast %156 : vector<1x128xf32> to vector<12x128xf32>
      %158 = arith.mulf %154, %157 : vector<12x128xf32>
      %159 = arith.addf %153, %158 : vector<12x128xf32>
      %160 = vector.extract_strided_slice %141 {offsets = [3, 0], sizes = [12, 128], strides = [1, 1]} : vector<16x128xf32> to vector<12x128xf32>
      %c4_77 = arith.constant 4 : index
      %c3_78 = arith.constant 3 : index
      %c0_79 = arith.constant 0 : index
      %161 = vector.load %arg2[%c4_77, %c3_78, %c0_79] : memref<5x5x128xf32, #tpu.memory_space<vmem>>, vector<1x1x128xf32>
      %162 = vector.shape_cast %161 : vector<1x1x128xf32> to vector<1x128xf32>
      %163 = vector.broadcast %162 : vector<1x128xf32> to vector<12x128xf32>
      %164 = arith.mulf %160, %163 : vector<12x128xf32>
      %165 = arith.addf %159, %164 : vector<12x128xf32>
      %166 = vector.extract_strided_slice %141 {offsets = [4, 0], sizes = [12, 128], strides = [1, 1]} : vector<16x128xf32> to vector<12x128xf32>
      %c4_80 = arith.constant 4 : index
      %c4_81 = arith.constant 4 : index
      %c0_82 = arith.constant 0 : index
      %167 = vector.load %arg2[%c4_80, %c4_81, %c0_82] : memref<5x5x128xf32, #tpu.memory_space<vmem>>, vector<1x1x128xf32>
      %168 = vector.shape_cast %167 : vector<1x1x128xf32> to vector<1x128xf32>
      %169 = vector.broadcast %168 : vector<1x128xf32> to vector<12x128xf32>
      %170 = arith.mulf %166, %169 : vector<12x128xf32>
      %171 = arith.addf %165, %170 : vector<12x128xf32>
      %172 = vector.shape_cast %171 : vector<12x128xf32> to vector<1x12x128xf32>
      %173 = arith.index_cast %arg4 : i32 to index
      %c0_83 = arith.constant 0 : index
      %c0_84 = arith.constant 0 : index
      %174 = vector.load %arg3[%173, %c0_83, %c0_84] : memref<12x12x128xf32, #tpu.memory_space<vmem>>, vector<1x12x128xf32>
      tpu.vector_store %arg3[%173, %c0_83, %c0_84], %172 {strides = array<i32>} : memref<12x12x128xf32, #tpu.memory_space<vmem>>, vector<1x12x128xf32>,
    }
    %c12_i32_0 = arith.constant 12 : i32
    return
  }
  func.func @transform_0(%arg0: i32) -> (i32, i32, i32) {
    %c0_i32 = arith.constant 0 : i32
    %c0_i32_0 = arith.constant 0 : i32
    %c0_i32_1 = arith.constant 0 : i32
    return %c0_i32, %c0_i32_0, %arg0 : i32, i32, i32
  }
  func.func @transform_1(%arg0: i32) -> (i32, i32, i32) {
    %c0_i32 = arith.constant 0 : i32
    %c0_i32_0 = arith.constant 0 : i32
    %c0_i32_1 = arith.constant 0 : i32
    return %c0_i32, %c0_i32_0, %arg0 : i32, i32, i32
  }
  func.func @transform_2(%arg0: i32) -> (i32, i32, i32) {
    %c0_i32 = arith.constant 0 : i32
    %c0_i32_0 = arith.constant 0 : i32
    %c0_i32_1 = arith.constant 0 : i32
    return %c0_i32, %c0_i32_0, %arg0 : i32, i32, i32
  }
}

</mosaic_0001>

<bundles_post_ra>
// kernel: tpu_custom_call.1
= control target key start
LH: loop header
LB: loop body
LE: loop exit
PB: predicated region body
PF: predicated region fallthrough
CT: control target
= control target key end

     0   :  { %7 = vsyncpa [#allocation3], 0  ;;  %s726_s0 = inlined_call_operand.hbm [shape: f32[16,16,128], index: 0, kind: input, shape index: {}]   ;;  %s727_s1 = inlined_call_operand.hbm [shape: f32[5,5,128], index: 1, kind: input, shape index: {}]   ;;  %s728_s2 = inlined_call_operand.hbm [shape: f32[12,12,128], index: 2, kind: output, shape index: {}]  }
   0x1   :  { %8 = vsyncpa [#allocation6], 0 }
   0x2   :  { %9 = vsyncpa [#allocation4], 0  ;;  %s616_s9 = smov [#allocation2]   ;;  %s536_s13 = scalar_lea.hbm %s726_s0, 4096 }
   0x3   :  { %s15_s10 = sshll.u32 %s616_s9, 4  ;;  %p537_p0 = scmp.ne.s32.totalorder %s726_s0, %s536_s13  ;;  %s16_s10 = int_to_ptr.vmem [resolvable:$true] %s15_s10 }
   0x4   :  { %p540_p1 = scmp.lt.u32.totalorder %s536_s13, %s726_s0 }
   0x6   :  { %p542_p2 = pnand %p540_p1, %p537_p0 }
   0x8   :  { %545 = shalt.err (!%p542_p2)
}
   0x9   :  { %s546_s18 = scalar_lea.vmem %s16_s10, 4096  ;;  %p551_p4 = scmp.lt.s32.totalorder %s16_s10, %s16_s10 }
   0xa   :  { %p547_p3 = scmp.ne.s32.totalorder %s16_s10, %s546_s18  ;;  %p552_p5 = scmp.lt.s32.totalorder %s546_s18, %s546_s18 }
   0xc   :  { %p553_p6 = por %p552_p5, %p551_p4 }
   0xe   :  { %p554_p7 = pnand %p553_p6, %p547_p3 }
  0x10   :  { %557 = shalt.err (!%p554_p7)
}
  0x11   :  { %s617_s19 = smov 128   ;;  %s618_s20 = smov 8  }
  0x12   :  { %21 = dma.hbm_to_vmem [thread:$0]  %s726_s0, 4096, %s16_s10, [#allocation3], %s617_s19, %s617_s19, %s618_s20  }
  0x13   :  { %s619_s23 = smov [#allocation5]   ;;  %s558_s27 = scalar_lea.hbm %s727_s1, 640 }
  0x14   :  { %s27_s24 = sshll.u32 %s619_s23, 4  ;;  %p559_p8 = scmp.ne.s32.totalorder %s727_s1, %s558_s27  ;;  %s28_s24 = int_to_ptr.vmem [resolvable:$true] %s27_s24 }
  0x15   :  { %p562_p9 = scmp.lt.u32.totalorder %s558_s27, %s727_s1 }
  0x17   :  { %p564_p10 = pnand %p562_p9, %p559_p8 }
  0x19   :  { %567 = shalt.err (!%p564_p10)
}
  0x1a   :  { %s568_s4 = scalar_lea.vmem %s28_s24, 640  ;;  %p573_p12 = scmp.lt.s32.totalorder %s28_s24, %s28_s24 }
  0x1b   :  { %p569_p11 = scmp.ne.s32.totalorder %s28_s24, %s568_s4  ;;  %p574_p13 = scmp.lt.s32.totalorder %s568_s4, %s568_s4 }
  0x1d   :  { %p575_p0 = por %p574_p13, %p573_p12 }
  0x1f   :  { %p576_p1 = pnand %p575_p0, %p569_p11 }
  0x21   :  { %579 = shalt.err (!%p576_p1)
}
  0x22   :  { %33 = dma.hbm_to_vmem [thread:$0]  %s727_s1, 640, %s28_s24, [#allocation6], %s617_s19, %s617_s19, %s618_s20  }
  0x23   :  { %606 = dma.done.wait [#allocation3], 4096  }
  0x24   :  { %607 = vsyncadd [#allocation3], 4294963200 }
  0x25   :  { %608 = dma.done.wait [#allocation6], 640  }
  0x26   :  { %609 = vsyncadd [#allocation6], 4294966656  ;;  %s666_s6 = smov 0  }
  0x27 LB: > { %s485_s7 = sshll.u32 %s614_s6, 4  ;;  %v486_v0 = vld [vmem:[#allocation5] ss:$0 sm:$0xff]  ;;  %v487_v1 = vld [vmem:[#allocation5 + $0x1] ss:$0 sm:$0xff]  ;;  %vm68_vm0 = vcmask 1046528   ;;  %s614_s6 = sphi %s666_s6, %s45_s6  }
  0x28   : > { %v488_v2 = vld [vmem:[#allocation5 + $0x2] ss:$0 sm:$0xff]  ;;  %vm85_vm1 = vcmask 1045504   ;;  %v489_v3 = vld [vmem:[#allocation5 + $0x3] ss:$0 sm:$0xff]  ;;  %s674_s1 = scalar_lea.vmem [#allocation2], %s485_s7 }
  0x29   : > { %v48_v4 = vld [vmem:[%s674_s1] sm:$0xff]  ;;  %v49_v5 = vld [vmem:[%s674_s1 + $0x8] sm:$0xff]  ;;  %vm102_vm2 = vcmask 1044480   ;;  %vm119_vm3 = vcmask 1043456   ;;  %v492_v25 = vld [vmem:[%s674_s1 + $0x10] sm:$0xff]  ;;  %s443_s8 = scalar_lea.vmem [#allocation7], %s485_s7 }
  0x2a   : > { %v490_v6 = vld [vmem:[#allocation5 + $0x4] ss:$0 sm:$0xff]  ;;  %v55_v7 = vmul.f32 %v486_v0, %v48_v4  ;;  %v56_v8 = vmul.f32 %v486_v0, %v49_v5  ;;  %v64_v9 = vmul.f32 %v487_v1, %v48_v4  ;;  %v65_v10 = vmul.f32 %v487_v1, %v49_v5  ;;  %v494_v19 = vld [vmem:[#allocation5 + $0x8] ss:$0 sm:$0xff]  ;;  %v495_v20 = vld [vmem:[#allocation5 + $0x9] ss:$0 sm:$0xff] }
  0x2b   : > { %v81_v11 = vmul.f32 %v488_v2, %v48_v4  ;;  %v82_v12 = vmul.f32 %v488_v2, %v49_v5  ;;  %v98_v13 = vmul.f32 %v489_v3, %v48_v4  ;;  %v99_v14 = vmul.f32 %v489_v3, %v49_v5  ;;  %v493_v26 = vld [vmem:[%s674_s1 + $0x18] sm:$0xff]  ;;  %v496_v31 = vld [vmem:[#allocation5 + $0xa] ss:$0 sm:$0xff]  ;;  %v497_v35 = vld [vmem:[#allocation5 + $0xb] ss:$0 sm:$0xff]  ;;  %s45_s6 = sadd.s32 1, %s614_s6  }
  0x2c   : > { %v69_v15 = vrot.slane %v64_v9, 1  ;;  %v70_v16 = vrot.slane %v65_v10, 1  ;;  %v115_v17 = vmul.f32 %v490_v6, %v48_v4  ;;  %v116_v18 = vmul.f32 %v490_v6, %v49_v5  ;;  %v498_v44 = vld [vmem:[#allocation5 + $0xc] ss:$0 sm:$0xff]  ;;  %v500_v56 = vld [vmem:[%s674_s1 + $0x20] sm:$0xff]  ;;  %p42_p2 = scmp.ge.s32.totalorder %s45_s6, 12  }
  0x2d   : > { %v86_v21 = vrot.slane %v81_v11, 2  ;;  %v87_v22 = vrot.slane %v82_v12, 2  ;;  %v103_v23 = vrot.slane %v98_v13, 3  ;;  %v104_v24 = vrot.slane %v99_v14, 3  ;;  %v503_v57 = vld [vmem:[#allocation5 + $0x11] ss:$0 sm:$0xff] }
  0x2e   : > { %v71_v27 = vsel %vm68_vm0, %v69_v15, %v70_v16  ;;  %v75_v28 = vadd.f32 %v70_v16, %v56_v8  ;;  %v120_v29 = vrot.slane %v115_v17, 4  ;;  %v121_v30 = vrot.slane %v116_v18, 4  ;;  %v501_v60 = vld [vmem:[%s674_s1 + $0x28] sm:$0xff]  ;;  %v504_v5 = vld [vmem:[#allocation5 + $0x12] ss:$0 sm:$0xff]  ;;  %s620_s9 = smov (%p42_p2), [#allocation7]  }
  0x2f   : > { %v74_v32 = vadd.f32 %v71_v27, %v55_v7  ;;  %v88_v33 = vsel %vm85_vm1, %v86_v21, %v87_v22  ;;  %v105_v34 = vsel %vm102_vm2, %v103_v23, %v104_v24  ;;  %v139_v38 = vmul.f32 %v494_v19, %v493_v26  ;;  %v502_v8 = vld [vmem:[#allocation5 + $0x10] ss:$0 sm:$0xff]  ;;  %v505_v11 = vld [vmem:[#allocation5 + $0x13] ss:$0 sm:$0xff]  ;;  %v506_v16 = vld [vmem:[#allocation5 + $0x14] ss:$0 sm:$0xff] }
  0x30   : > { %v92_v36 = vadd.f32 %v87_v22, %v75_v28  ;;  %v122_v37 = vsel %vm119_vm3, %v120_v29, %v121_v30  ;;  %v147_v39 = vmul.f32 %v495_v20, %v492_v25  ;;  %v148_v41 = vmul.f32 %v495_v20, %v493_v26  ;;  %s451_s10 = sshll.u32 (%p42_p2), %s620_s9, 4  ;;  %s452_s10 = int_to_ptr.vmem [resolvable:$true] %s451_s10 }
  0x31   : > { %v91_v40 = vadd.f32 %v88_v33, %v74_v32  ;;  %v163_v42 = vmul.f32 %v496_v31, %v492_v25  ;;  %v164_v43 = vmul.f32 %v496_v31, %v493_v26  ;;  %v179_v47 = vmul.f32 %v497_v35, %v492_v25  ;;  %v508_v32 = vld [vmem:[%s674_s1 + $0x30] sm:$0xff]  ;;  %v511_v33 = vld [vmem:[#allocation5 + $0x19] ss:$0 sm:$0xff]  ;;  %s580_s11 = scalar_lea.vmem (%p42_p2), %s452_s10, 3072  ;;  %p585_p4 = scmp.lt.s32.totalorder (%p42_p2), %s452_s10, %s452_s10 }
  0x32   : > { %v109_v45 = vadd.f32 %v104_v24, %v92_v36  ;;  %v151_v46 = vrot.slane %v147_v39, 1  ;;  %v180_v48 = vmul.f32 %v497_v35, %v493_v26  ;;  %v138_v50 = vmul.f32 %v494_v19, %v492_v25  ;;  %v509_v35 = vld [vmem:[%s674_s1 + $0x38] sm:$0xff]  ;;  %p581_p3 = scmp.ne.s32.totalorder (%p42_p2), %s452_s10, %s580_s11  ;;  %p586_p5 = scmp.lt.s32.totalorder (%p42_p2), %s580_s11, %s580_s11 }
  0x33   : > { %v108_v49 = vadd.f32 %v105_v34, %v91_v40  ;;  %v152_v51 = vrot.slane %v148_v41, 1  ;;  %v167_v53 = vrot.slane %v163_v42, 2  ;;  %v168_v54 = vrot.slane %v164_v43, 2 }
  0x34   : > { %v126_v52 = vadd.f32 %v121_v30, %v109_v45  ;;  %v195_v55 = vmul.f32 %v498_v44, %v492_v25  ;;  %v196_v59 = vmul.f32 %v498_v44, %v493_v26  ;;  %v183_v63 = vrot.slane %v179_v47, 3  ;;  %v512_v44 = vld [vmem:[#allocation5 + $0x1a] ss:$0 sm:$0xff]  ;;  %v510_v47 = vld [vmem:[#allocation5 + $0x18] ss:$0 sm:$0xff]  ;;  %p587_p6 = por (%p42_p2), %p586_p5, %p585_p4 }
  0x35   : > { %v125_v58 = vadd.f32 %v122_v37, %v108_v49  ;;  %v153_v62 = vsel %vm68_vm0, %v151_v46, %v152_v51  ;;  %v184_v0 = vrot.slane %v180_v48, 3  ;;  %v226_v4 = vmul.f32 %v503_v57, %v500_v56 }
  0x36   : > { %v141_v61 = vadd.f32 %v139_v38, %v126_v52  ;;  %v199_v2 = vrot.slane %v195_v55, 4  ;;  %v200_v3 = vrot.slane %v196_v59, 4  ;;  %v169_v7 = vsel %vm85_vm1, %v167_v53, %v168_v54  ;;  %v514_v55 = vld [vmem:[#allocation5 + $0x1c] ss:$0 sm:$0xff]  ;;  %p588_p7 = pnand (%p42_p2), %p587_p6, %p581_p3 }
  0x37   : > { %v140_v1 = vadd.f32 %v138_v50, %v125_v58  ;;  %v227_v9 = vmul.f32 %v503_v57, %v501_v60  ;;  %v185_v13 = vsel %vm102_vm2, %v183_v63, %v184_v0  ;;  %v242_v14 = vmul.f32 %v504_v5, %v500_v56  ;;  %v513_v50 = vld [vmem:[#allocation5 + $0x1b] ss:$0 sm:$0xff] }
  0x38   : > { %v157_v6 = vadd.f32 %v152_v51, %v141_v61  ;;  %v243_v15 = vmul.f32 %v504_v5, %v501_v60  ;;  %v201_v18 = vsel %vm119_vm3, %v199_v2, %v200_v3  ;;  %v218_v19 = vmul.f32 %v502_v8, %v501_v60 }
  0x39   : > { %v156_v10 = vadd.f32 %v153_v62, %v140_v1  ;;  %v230_v20 = vrot.slane %v226_v4, 1  ;;  %v231_v22 = vrot.slane %v227_v9, 1  ;;  %v258_v23 = vmul.f32 %v505_v11, %v500_v56 }
  0x3a   : > { %v173_v12 = vadd.f32 %v168_v54, %v157_v6  ;;  %v259_v24 = vmul.f32 %v505_v11, %v501_v60  ;;  %v217_v26 = vmul.f32 %v502_v8, %v500_v56  ;;  %v274_v27 = vmul.f32 %v506_v16, %v500_v56  ;;  %v519_v8 = vld [vmem:[#allocation5 + $0x21] ss:$0 sm:$0xff] }
  0x3b   : > { %v172_v17 = vadd.f32 %v169_v7, %v156_v10  ;;  %v275_v28 = vmul.f32 %v506_v16, %v501_v60  ;;  %v246_v30 = vrot.slane %v242_v14, 2  ;;  %v247_v31 = vrot.slane %v243_v15, 2  ;;  %v516_v7 = vld [vmem:[%s674_s1 + $0x40] sm:$0xff]  ;;  %v517_v10 = vld [vmem:[%s674_s1 + $0x48] sm:$0xff] }
  0x3c   : > { %v189_v21 = vadd.f32 %v184_v0, %v173_v12  ;;  %v232_v37 = vsel %vm68_vm0, %v230_v20, %v231_v22  ;;  %v262_v38 = vrot.slane %v258_v23, 3  ;;  %v263_v39 = vrot.slane %v259_v24, 3  ;;  %v520_v15 = vld [vmem:[#allocation5 + $0x22] ss:$0 sm:$0xff] }
  0x3d   : > { %v188_v25 = vadd.f32 %v185_v13, %v172_v17  ;;  %v278_v41 = vrot.slane %v274_v27, 4  ;;  %v279_v42 = vrot.slane %v275_v28, 4  ;;  %v305_v43 = vmul.f32 %v511_v33, %v508_v32 }
  0x3e   : > { %v205_v29 = vadd.f32 %v200_v3, %v189_v21  ;;  %v248_v46 = vsel %vm85_vm1, %v246_v30, %v247_v31  ;;  %v306_v48 = vmul.f32 %v511_v33, %v509_v35  ;;  %v264_v52 = vsel %vm102_vm2, %v262_v38, %v263_v39 }
  0x3f   : > { %v204_v34 = vadd.f32 %v201_v18, %v188_v25  ;;  %v321_v53 = vmul.f32 %v512_v44, %v508_v32  ;;  %v322_v54 = vmul.f32 %v512_v44, %v509_v35  ;;  %v280_v57 = vsel %vm119_vm3, %v278_v41, %v279_v42 }
  0x40   : > { %v220_v36 = vadd.f32 %v218_v19, %v205_v29  ;;  %v297_v58 = vmul.f32 %v510_v47, %v509_v35  ;;  %v309_v59 = vrot.slane %v305_v43, 1  ;;  %v310_v61 = vrot.slane %v306_v48, 1 }
  0x41   : > { %v219_v40 = vadd.f32 %v217_v26, %v204_v34  ;;  %v337_v62 = vmul.f32 %v513_v50, %v508_v32  ;;  %v338_v63 = vmul.f32 %v513_v50, %v509_v35  ;;  %v296_v1 = vmul.f32 %v510_v47, %v508_v32  ;;  %v521_v26 = vld [vmem:[#allocation5 + $0x23] ss:$0 sm:$0xff]  ;;  %v522_v34 = vld [vmem:[#allocation5 + $0x24] ss:$0 sm:$0xff] }
  0x42   : > { %v236_v45 = vadd.f32 %v231_v22, %v220_v36  ;;  %v353_v2 = vmul.f32 %v514_v55, %v508_v32  ;;  %v354_v3 = vmul.f32 %v514_v55, %v509_v35  ;;  %v325_v5 = vrot.slane %v321_v53, 2  ;;  %v518_v22 = vld [vmem:[#allocation5 + $0x20] ss:$0 sm:$0xff] }
  0x43   : > { %v235_v49 = vadd.f32 %v232_v37, %v219_v40  ;;  %v326_v6 = vrot.slane %v322_v54, 2  ;;  %v311_v12 = vsel %vm68_vm0, %v309_v59, %v310_v61  ;;  %v341_v13 = vrot.slane %v337_v62, 3 }
  0x44   : > { %v252_v51 = vadd.f32 %v247_v31, %v236_v45  ;;  %v342_v14 = vrot.slane %v338_v63, 3  ;;  %v357_v17 = vrot.slane %v353_v2, 4  ;;  %v358_v18 = vrot.slane %v354_v3, 4 }
  0x45   : > { %v251_v56 = vadd.f32 %v248_v46, %v235_v49  ;;  %v384_v19 = vmul.f32 %v519_v8, %v516_v7  ;;  %v327_v21 = vsel %vm85_vm1, %v325_v5, %v326_v6  ;;  %v385_v23 = vmul.f32 %v519_v8, %v517_v10 }
  0x46   : > { %v268_v60 = vadd.f32 %v263_v39, %v252_v51  ;;  %v400_v25 = vmul.f32 %v520_v15, %v516_v7  ;;  %v343_v28 = vsel %vm102_vm2, %v341_v13, %v342_v14  ;;  %v401_v29 = vmul.f32 %v520_v15, %v517_v10 }
  0x47   : > { %v267_v0 = vadd.f32 %v264_v52, %v251_v56  ;;  %v359_v31 = vsel %vm119_vm3, %v357_v17, %v358_v18  ;;  %v376_v32 = vmul.f32 %v518_v22, %v517_v10  ;;  %v388_v33 = vrot.slane %v384_v19, 1 }
  0x48   : > { %v284_v4 = vadd.f32 %v279_v42, %v268_v60  ;;  %v389_v36 = vrot.slane %v385_v23, 1  ;;  %v416_v37 = vmul.f32 %v521_v26, %v516_v7  ;;  %v417_v38 = vmul.f32 %v521_v26, %v517_v10 }
  0x49   : > { %v283_v9 = vadd.f32 %v280_v57, %v267_v0  ;;  %v375_v40 = vmul.f32 %v518_v22, %v516_v7  ;;  %v404_v41 = vrot.slane %v400_v25, 2  ;;  %v405_v43 = vrot.slane %v401_v29, 2 }
  0x4a   : > { %v299_v11 = vadd.f32 %v297_v58, %v284_v4  ;;  %v432_v44 = vmul.f32 %v522_v34, %v516_v7  ;;  %v433_v45 = vmul.f32 %v522_v34, %v517_v10  ;;  %v390_v48 = vsel %vm68_vm0, %v388_v33, %v389_v36 }
  0x4b   : > { %v298_v16 = vadd.f32 %v296_v1, %v283_v9  ;;  %v420_v49 = vrot.slane %v416_v37, 3  ;;  %v421_v50 = vrot.slane %v417_v38, 3  ;;  %v406_v53 = vsel %vm85_vm1, %v404_v41, %v405_v43 }
  0x4c   : > { %v315_v20 = vadd.f32 %v310_v61, %v299_v11  ;;  %v436_v54 = vrot.slane %v432_v44, 4  ;;  %v437_v55 = vrot.slane %v433_v45, 4 }
  0x4d   : > { %v314_v24 = vadd.f32 %v311_v12, %v298_v16  ;;  %v422_v58 = vsel %vm102_vm2, %v420_v49, %v421_v50 }
  0x4e   : > { %v331_v27 = vadd.f32 %v326_v6, %v315_v20  ;;  %v438_v61 = vsel %vm119_vm3, %v436_v54, %v437_v55 }
  0x4f   : > { %v330_v30 = vadd.f32 %v327_v21, %v314_v24 }
  0x50   : > { %v347_v35 = vadd.f32 %v342_v14, %v331_v27 }
  0x51   : > { %v346_v39 = vadd.f32 %v343_v28, %v330_v30 }
  0x52   : > { %v363_v42 = vadd.f32 %v358_v18, %v347_v35 }
  0x53   : > { %v362_v46 = vadd.f32 %v359_v31, %v346_v39 }
  0x54   : > { %v378_v47 = vadd.f32 %v376_v32, %v363_v42 }
  0x55   : > { %v377_v51 = vadd.f32 %v375_v40, %v362_v46 }
  0x56   : > { %v394_v52 = vadd.f32 %v389_v36, %v378_v47 }
  0x57   : > { %v393_v56 = vadd.f32 %v390_v48, %v377_v51 }
  0x58   : > { %v410_v57 = vadd.f32 %v405_v43, %v394_v52 }
  0x59   : > { %v409_v59 = vadd.f32 %v406_v53, %v393_v56  ;;  %44 = sbr.rel (!%p42_p2) target bundleno = 39 (0x27), region = 53 }
  0x5a   : > { %v426_v60 = vadd.f32 %v421_v50, %v410_v57 }
  0x5b   : > { %v425_v62 = vadd.f32 %v422_v58, %v409_v59 }
  0x5c   : > { %v442_v63 = vadd.f32 %v437_v55, %v426_v60 }
  0x5d   : > { %v441_v0 = vadd.f32 %v438_v61, %v425_v62 }
  0x5e   : > { %445 = vst [vmem:[%s443_s8 + $0x8] sm:$0xf] %v442_v63 }
  0x5f   : > { %444 = vst [vmem:[%s443_s8] sm:$0xff] %v441_v0 }
  0x60   :  { %591 = shalt.err (!%p588_p7)
}
  0x61   :  { %s592_s14 = scalar_lea.hbm %s728_s2, 3072 }
  0x62   :  { %p593_p8 = scmp.ne.s32.totalorder %s728_s2, %s592_s14  ;;  %p596_p9 = scmp.lt.u32.totalorder %s592_s14, %s728_s2 }
  0x64   :  { %p598_p10 = pnand %p596_p9, %p593_p8 }
  0x66   :  { %601 = shalt.err (!%p598_p10)
}
  0x67   :  { %457 = dma.vmem_to_hbm [thread:$0]  %s452_s10, 3072, %s728_s2, [#allocation4], %s617_s19, %s617_s19, %s618_s20  }
  0x68   :  { %610 = dma.done.wait [#allocation4], 3072  }
  0x69   :  { %611 = vsyncadd [#allocation4], 4294964224 }
  0x6a   :  { %461 = vsyncpa [#allocation3], 1 }
  0x6b   :  { %462 = vsyncpa [#allocation6], 1 }
  0x6c   :  { %463 = vsyncpa [#allocation4], 1 }

</bundles_post_ra>
